<compile_context>
chip_gen: v5e
topology: v5e:2x2
jax: 0.10.0
libtpu: 0.0.40
codegen_flags: <defaults>
</compile_context>

<pallas_src>
import jax
import jax.numpy as jnp
from jax.experimental import pallas as pl
from jax.experimental.pallas import tpu as pltpu


def _round_up(x, m):
    return ((x + m - 1) // m) * m


def _pad_to(a, shape):
    pads = [(0, t - s) for s, t in zip(a.shape, shape)]
    if all(p == (0, 0) for p in pads):
        return a
    return jnp.pad(a, pads)


def _critic_kernel(s_ref, a_ref, w1s_ref, w1a_ref, b1_ref,
                   w2_ref, b2_ref, w3_ref, b3_ref, o_ref):
    # Layer 1: concat(state, action) @ W1 folded into two MXU matmuls.
    h1 = (jnp.dot(s_ref[...], w1s_ref[...], preferred_element_type=jnp.float32)
          + jnp.dot(a_ref[...], w1a_ref[...], preferred_element_type=jnp.float32)
          + b1_ref[...])
    h1 = jnp.maximum(h1, 0.0).astype(jnp.bfloat16)

    # Layer 2.
    h2 = jnp.dot(h1, w2_ref[...], preferred_element_type=jnp.float32) + b2_ref[...]
    h2 = jnp.maximum(h2, 0.0).astype(jnp.bfloat16)

    # Layer 3: narrow (value_dim-wide) output, no 128-padding of the store.
    o_ref[...] = (jnp.dot(h2, w3_ref[...], preferred_element_type=jnp.float32)
                  + b3_ref[...])


def init_critic_params(key, combined_dim, hidden_size, value_dim=1):
    """nn.Linear-style init: U(-1/sqrt(fan_in), 1/sqrt(fan_in)).
    Weights stored as [in_features, out_features] (y = x @ W + b)."""
    def linear(k, fan_in, fan_out):
        kw, kb = jax.random.split(k)
        bound = 1.0 / jnp.sqrt(fan_in)
        w = jax.random.uniform(kw, (fan_in, fan_out), jnp.float32, -bound, bound)
        b = jax.random.uniform(kb, (fan_out,), jnp.float32, -bound, bound)
        return w, b

    k1, k2, k3 = jax.random.split(key, 3)
    w1, b1 = linear(k1, combined_dim, hidden_size)
    w2, b2 = linear(k2, hidden_size, hidden_size)
    w3, b3 = linear(k3, hidden_size, value_dim)
    return (w1, b1, w2, b2, w3, b3)


def prepare_critic_params(params, state_dim, action_dim):
    """One-time prep: split fc1 into state/action parts, pad to TPU tiles,
    cast weights to bf16 (biases stay f32). Zero padding is mathematically
    inert. Call once; reuse the result for every forward call."""
    w1, b1, w2, b2, w3, b3 = params
    H = w1.shape[1]
    V = w3.shape[1]

    SP = _round_up(state_dim, 128)
    AP = _round_up(action_dim, 128)
    HP = _round_up(H, 128)

    w1s = _pad_to(w1[:state_dim], (SP, HP)).astype(jnp.bfloat16)
    w1a = _pad_to(w1[state_dim:], (AP, HP)).astype(jnp.bfloat16)
    b1p = _pad_to(b1.reshape(1, -1).astype(jnp.float32), (1, HP))
    w2p = _pad_to(w2, (HP, HP)).astype(jnp.bfloat16)
    b2p = _pad_to(b2.reshape(1, -1).astype(jnp.float32), (1, HP))
    w3p = _pad_to(w3, (HP, V)).astype(jnp.bfloat16)        # value_dim kept un-padded
    b3p = b3.reshape(1, -1).astype(jnp.float32)            # (1, V)
    return (w1s, w1a, b1p, w2p, b2p, w3p, b3p)


@jax.jit
def critic_forward(state, action, prepared):
    """Pallas implementation of CriticNetwork.forward(state, action)."""
    w1s, w1a, b1, w2, b2, w3, b3 = prepared
    B = state.shape[0]
    SP, HP = w1s.shape
    AP = w1a.shape[0]
    V = w3.shape[1]

    # Batch tile: large enough to feed the MXU, small enough that the f32
    # intermediates (TB x HP) stay tiny even against v5e's 16 MiB scoped VMEM
    # and v7x's 64 MiB physical VMEM.
    TB = min(256, _round_up(B, 8))
    BP = _round_up(B, TB)
    grid = (BP // TB,)

    # Only per-call data movement: cast+pad the (small) activations to bf16.
    s_p = _pad_to(state.astype(jnp.bfloat16), (BP, SP))
    a_p = _pad_to(action.astype(jnp.bfloat16), (BP, AP))

    def const(shape):
        # Weight / bias blocks: constant index_map -> fetched once, stays in VMEM.
        return pl.BlockSpec(shape, lambda i: (0,) * len(shape))

    flops = 2 * BP * (SP * HP + AP * HP + HP * HP + HP * V)
    bytes_accessed = (
        s_p.size * 2 + a_p.size * 2
        + (w1s.size + w1a.size + w2.size + w3.size) * 2
        + (b1.size + b2.size + b3.size) * 4
        + BP * V * 4)

    # Rough VMEM budget: double-buffered operands + output + f32 intermediates.
    vmem_est = 2 * (TB * (SP + AP) * 2
                    + (SP + AP + HP) * HP * 2 + HP * V * 2
                    + (2 * HP + V) * 4
                    + TB * V * 4) + 4 * TB * HP * 4
    vmem_limit = int(min(48 * 1024 * 1024, max(16 * 1024 * 1024, 2 * vmem_est)))

    out_p = pl.pallas_call(
        _critic_kernel,
        out_shape=jax.ShapeDtypeStruct((BP, V), jnp.float32),
        grid=grid,
        in_specs=[
            pl.BlockSpec((TB, SP), lambda i: (i, 0)),   # state tile
            pl.BlockSpec((TB, AP), lambda i: (i, 0)),   # action tile
            const((SP, HP)),                            # w1 (state part)
            const((AP, HP)),                            # w1 (action part)
            const((1, HP)),                             # b1
            const((HP, HP)),                            # w2
            const((1, HP)),                             # b2
            const((HP, V)),                             # w3 (un-padded value_dim)
            const((1, V)),                              # b3
        ],
        out_specs=pl.BlockSpec((TB, V), lambda i: (i, 0)),
        compiler_params=pltpu.CompilerParams(
            dimension_semantics=("parallel",),
            vmem_limit_bytes=vmem_limit,
        ),
        cost_estimate=pl.CostEstimate(
            flops=flops, transcendentals=0, bytes_accessed=bytes_accessed),
    )(s_p, a_p, w1s, w1a, b1, w2, b2, w3, b3)

    out = out_p[:B, :]          # (B, value_dim)
    return jnp.squeeze(out)     # matches torch .squeeze()


# ----------------------------- references ----------------------------------

def _reference_forward_f32(state, action, params):
    w1, b1, w2, b2, w3, b3 = params
    x = jnp.concatenate([state, action], axis=-1)
    hi = jax.lax.Precision.HIGHEST
    x = jax.nn.relu(jnp.dot(x, w1, precision=hi) + b1)
    x = jax.nn.relu(jnp.dot(x, w2, precision=hi) + b2)
    return jnp.squeeze(jnp.dot(x, w3, precision=hi) + b3)


def _reference_forward_bf16(state, action, params):
    """Emulates the kernel's numerics: bf16 operands, f32 accumulate/bias/ReLU."""
    w1, b1, w2, b2, w3, b3 = params
    q = lambda t: t.astype(jnp.bfloat16).astype(jnp.float32)
    hi = jax.lax.Precision.HIGHEST
    x = q(jnp.concatenate([state, action], axis=-1))
    h = jnp.maximum(jnp.dot(x, q(w1), precision=hi) + b1, 0.0)
    h = jnp.maximum(jnp.dot(q(h), q(w2), precision=hi) + b2, 0.0)
    out = jnp.dot(q(h), q(w3), precision=hi) + b3
    return jnp.squeeze(out)


if __name__ == "__main__":
    B = 2
    state_dim = 8
    action_dim = 4
    hidden_size = 32
    value_dim = 1
    combined_dim = state_dim + action_dim

    key = jax.random.PRNGKey(0)
    kp, ks, ka = jax.random.split(key, 3)

    params = init_critic_params(kp, combined_dim, hidden_size, value_dim)
    prepared = prepare_critic_params(params, state_dim, action_dim)  # one-time prep

    state = jax.random.normal(ks, (B, state_dim), jnp.float32)
    action = jax.random.normal(ka, (B, action_dim), jnp.float32)

    out = critic_forward(state, action, prepared)
    out = jax.block_until_ready(out)

    ref_bf16 = _reference_forward_bf16(state, action, params)
    ref_f32 = _reference_forward_f32(state, action, params)

    assert out.shape == ref_f32.shape == (B,), (out.shape, ref_f32.shape)
    # Tight check vs. a reference that mimics the kernel's bf16/f32 numerics.
    assert jnp.allclose(out, ref_bf16, atol=2e-3, rtol=2e-3), (out, ref_bf16)
    # Loose check vs. the pure-f32 PyTorch-equivalent reference.
    assert jnp.allclose(out, ref_f32, atol=5e-2, rtol=5e-2), (out, ref_f32)

    print("KERNEL_OK")
</pallas_src>

<mosaic_0001>
module attributes {stable_mosaic.version = 11 : i64} {
  func.func @_critic_kernel(%arg0: i32, %arg1: memref<8x128xbf16, #tpu.memory_space<vmem>>, %arg2: memref<8x128xbf16, #tpu.memory_space<vmem>>, %arg3: memref<128x128xbf16, #tpu.memory_space<vmem>>, %arg4: memref<128x128xbf16, #tpu.memory_space<vmem>>, %arg5: memref<1x128xf32, #tpu.memory_space<vmem>>, %arg6: memref<128x128xbf16, #tpu.memory_space<vmem>>, %arg7: memref<1x128xf32, #tpu.memory_space<vmem>>, %arg8: memref<128x1xbf16, #tpu.memory_space<vmem>>, %arg9: memref<1x1xf32, #tpu.memory_space<vmem>>, %arg10: memref<8x1xf32, #tpu.memory_space<vmem>>) attributes {dimension_semantics = [#tpu.dimension_semantics<parallel>], iteration_bounds = array<i64: 1>, scalar_prefetch = 0 : i64, scratch_operands = 0 : i64, tpu.core_type = #tpu.core_type<tc>, window_params = [{transform_indices = @transform_0, window_bounds = array<i64: 8, 128>}, {transform_indices = @transform_1, window_bounds = array<i64: 8, 128>}, {pipeline_mode = #tpu.pipeline_mode<synchronous>, transform_indices = @transform_2, window_bounds = array<i64: 128, 128>}, {pipeline_mode = #tpu.pipeline_mode<synchronous>, transform_indices = @transform_3, window_bounds = array<i64: 128, 128>}, {pipeline_mode = #tpu.pipeline_mode<synchronous>, transform_indices = @transform_4, window_bounds = array<i64: 1, 128>}, {pipeline_mode = #tpu.pipeline_mode<synchronous>, transform_indices = @transform_5, window_bounds = array<i64: 128, 128>}, {pipeline_mode = #tpu.pipeline_mode<synchronous>, transform_indices = @transform_6, window_bounds = array<i64: 1, 128>}, {pipeline_mode = #tpu.pipeline_mode<synchronous>, transform_indices = @transform_7, window_bounds = array<i64: 128, 1>}, {pipeline_mode = #tpu.pipeline_mode<synchronous>, transform_indices = @transform_8, window_bounds = array<i64: 1, 1>}, {transform_indices = @transform_9, window_bounds = array<i64: 8, 1>}]} {
    %c0 = arith.constant 0 : index
    %c0_0 = arith.constant 0 : index
    %0 = vector.load %arg1[%c0, %c0_0] : memref<8x128xbf16, #tpu.memory_space<vmem>>, vector<8x128xbf16>
    %c0_1 = arith.constant 0 : index
    %c0_2 = arith.constant 0 : index
    %1 = vector.load %arg3[%c0_1, %c0_2] : memref<128x128xbf16, #tpu.memory_space<vmem>>, vector<128x128xbf16>
    %cst = arith.constant dense<0.000000e+00> : vector<8x128xf32>
    %2 = tpu.matmul %0, %1, %cst {dimension_numbers = #tpu.dot_dimension_numbers<[1], [0], [0], [1], [0, 0, 1, 1], [], []>} : vector<8x128xbf16>, vector<128x128xbf16>, vector<8x128xf32> -> vector<8x128xf32>
    %c0_3 = arith.constant 0 : index
    %c0_4 = arith.constant 0 : index
    %3 = vector.load %arg2[%c0_3, %c0_4] : memref<8x128xbf16, #tpu.memory_space<vmem>>, vector<8x128xbf16>
    %c0_5 = arith.constant 0 : index
    %c0_6 = arith.constant 0 : index
    %4 = vector.load %arg4[%c0_5, %c0_6] : memref<128x128xbf16, #tpu.memory_space<vmem>>, vector<128x128xbf16>
    %cst_7 = arith.constant dense<0.000000e+00> : vector<8x128xf32>
    %5 = tpu.matmul %3, %4, %cst_7 {dimension_numbers = #tpu.dot_dimension_numbers<[1], [0], [0], [1], [0, 0, 1, 1], [], []>} : vector<8x128xbf16>, vector<128x128xbf16>, vector<8x128xf32> -> vector<8x128xf32>
    %6 = arith.addf %2, %5 : vector<8x128xf32>
    %c0_8 = arith.constant 0 : index
    %c0_9 = arith.constant 0 : index
    %7 = vector.load %arg5[%c0_8, %c0_9] : memref<1x128xf32, #tpu.memory_space<vmem>>, vector<1x128xf32>
    %8 = vector.broadcast %7 : vector<1x128xf32> to vector<8x128xf32>
    %9 = arith.addf %6, %8 : vector<8x128xf32>
    %cst_10 = arith.constant 0.000000e+00 : f32
    %10 = vector.broadcast %cst_10 : f32 to vector<8x128xf32>
    %11 = arith.maximumf %9, %10 : vector<8x128xf32>
    %12 = arith.truncf %11 : vector<8x128xf32> to vector<8x128xbf16>
    %c0_11 = arith.constant 0 : index
    %c0_12 = arith.constant 0 : index
    %13 = vector.load %arg6[%c0_11, %c0_12] : memref<128x128xbf16, #tpu.memory_space<vmem>>, vector<128x128xbf16>
    %cst_13 = arith.constant dense<0.000000e+00> : vector<8x128xf32>
    %14 = tpu.matmul %12, %13, %cst_13 {dimension_numbers = #tpu.dot_dimension_numbers<[1], [0], [0], [1], [0, 0, 1, 1], [], []>} : vector<8x128xbf16>, vector<128x128xbf16>, vector<8x128xf32> -> vector<8x128xf32>
    %c0_14 = arith.constant 0 : index
    %c0_15 = arith.constant 0 : index
    %15 = vector.load %arg7[%c0_14, %c0_15] : memref<1x128xf32, #tpu.memory_space<vmem>>, vector<1x128xf32>
    %16 = vector.broadcast %15 : vector<1x128xf32> to vector<8x128xf32>
    %17 = arith.addf %14, %16 : vector<8x128xf32>
    %cst_16 = arith.constant 0.000000e+00 : f32
    %18 = vector.broadcast %cst_16 : f32 to vector<8x128xf32>
    %19 = arith.maximumf %17, %18 : vector<8x128xf32>
    %20 = arith.truncf %19 : vector<8x128xf32> to vector<8x128xbf16>
    %c0_17 = arith.constant 0 : index
    %c0_18 = arith.constant 0 : index
    %21 = vector.load %arg8[%c0_17, %c0_18] : memref<128x1xbf16, #tpu.memory_space<vmem>>, vector<128x1xbf16>
    %cst_19 = arith.constant dense<0.000000e+00> : vector<8x1xf32>
    %22 = tpu.matmul %20, %21, %cst_19 {dimension_numbers = #tpu.dot_dimension_numbers<[1], [0], [0], [1], [0, 0, 1, 1], [], []>} : vector<8x128xbf16>, vector<128x1xbf16>, vector<8x1xf32> -> vector<8x1xf32>
    %c0_20 = arith.constant 0 : index
    %c0_21 = arith.constant 0 : index
    %23 = vector.load %arg9[%c0_20, %c0_21] : memref<1x1xf32, #tpu.memory_space<vmem>>, vector<1x1xf32>
    %24 = vector.broadcast %23 : vector<1x1xf32> to vector<8x1xf32>
    %25 = arith.addf %22, %24 : vector<8x1xf32>
    %c0_22 = arith.constant 0 : index
    %c0_23 = arith.constant 0 : index
    %26 = vector.load %arg10[%c0_22, %c0_23] : memref<8x1xf32, #tpu.memory_space<vmem>>, vector<8x1xf32>
    tpu.vector_store %arg10[%c0_22, %c0_23], %25 {strides = array<i32>} : memref<8x1xf32, #tpu.memory_space<vmem>>, vector<8x1xf32>,
    return
  }
  func.func @transform_0(%arg0: i32) -> (i32, i32) {
    %c0_i32 = arith.constant 0 : i32
    %c0_i32_0 = arith.constant 0 : i32
    return %arg0, %c0_i32 : i32, i32
  }
  func.func @transform_1(%arg0: i32) -> (i32, i32) {
    %c0_i32 = arith.constant 0 : i32
    %c0_i32_0 = arith.constant 0 : i32
    return %arg0, %c0_i32 : i32, i32
  }
  func.func @transform_2(%arg0: i32) -> (i32, i32) {
    %c0_i32 = arith.constant 0 : i32
    %c0_i32_0 = arith.constant 0 : i32
    %c0_i32_1 = arith.constant 0 : i32
    return %c0_i32, %c0_i32_0 : i32, i32
  }
  func.func @transform_3(%arg0: i32) -> (i32, i32) {
    %c0_i32 = arith.constant 0 : i32
    %c0_i32_0 = arith.constant 0 : i32
    %c0_i32_1 = arith.constant 0 : i32
    return %c0_i32, %c0_i32_0 : i32, i32
  }
  func.func @transform_4(%arg0: i32) -> (i32, i32) {
    %c0_i32 = arith.constant 0 : i32
    %c0_i32_0 = arith.constant 0 : i32
    %c0_i32_1 = arith.constant 0 : i32
    return %c0_i32, %c0_i32_0 : i32, i32
  }
  func.func @transform_5(%arg0: i32) -> (i32, i32) {
    %c0_i32 = arith.constant 0 : i32
    %c0_i32_0 = arith.constant 0 : i32
    %c0_i32_1 = arith.constant 0 : i32
    return %c0_i32, %c0_i32_0 : i32, i32
  }
  func.func @transform_6(%arg0: i32) -> (i32, i32) {
    %c0_i32 = arith.constant 0 : i32
    %c0_i32_0 = arith.constant 0 : i32
    %c0_i32_1 = arith.constant 0 : i32
    return %c0_i32, %c0_i32_0 : i32, i32
  }
  func.func @transform_7(%arg0: i32) -> (i32, i32) {
    %c0_i32 = arith.constant 0 : i32
    %c0_i32_0 = arith.constant 0 : i32
    %c0_i32_1 = arith.constant 0 : i32
    return %c0_i32, %c0_i32_0 : i32, i32
  }
  func.func @transform_8(%arg0: i32) -> (i32, i32) {
    %c0_i32 = arith.constant 0 : i32
    %c0_i32_0 = arith.constant 0 : i32
    %c0_i32_1 = arith.constant 0 : i32
    return %c0_i32, %c0_i32_0 : i32, i32
  }
  func.func @transform_9(%arg0: i32) -> (i32, i32) {
    %c0_i32 = arith.constant 0 : i32
    %c0_i32_0 = arith.constant 0 : i32
    return %arg0, %c0_i32 : i32, i32
  }
}

</mosaic_0001>

<bundles_post_ra>
// kernel: critic_forward.1
= control target key start
LH: loop header
LB: loop body
LE: loop exit
PB: predicated region body
PF: predicated region fallthrough
CT: control target
= control target key end

     0   :  { %s746_s0 = inlined_call_operand.vmem [shape: bf16[8,128], index: 0, kind: input, shape index: {}]   ;;  %s747_s1 = inlined_call_operand.vmem [shape: bf16[8,128], index: 1, kind: input, shape index: {}]   ;;  %s748_s2 = inlined_call_operand.vmem [shape: bf16[128,128], index: 2, kind: input, shape index: {}]   ;;  %s749_s3 = inlined_call_operand.hbm [shape: bf16[128,128], index: 3, kind: input, shape index: {}]   ;;  %s750_s4 = inlined_call_operand.vmem [shape: f32[1,128], index: 4, kind: input, shape index: {}]   ;;  %s751_s5 = inlined_call_operand.hbm [shape: bf16[128,128], index: 5, kind: input, shape index: {}]   ;;  %s752_s6 = inlined_call_operand.vmem [shape: f32[1,128], index: 6, kind: input, shape index: {}]   ;;  %s753_s7 = inlined_call_operand.vmem [shape: bf16[128,1], index: 7, kind: input, shape index: {}]   ;;  %s754_s8 = inlined_call_operand.<no memory space> [shape: f32[1,1], index: 8, kind: input, shape index: {}]   ;;  %s755_s9 = inlined_call_operand.vmem [shape: f32[8,1], index: 9, kind: output, shape index: {}]  }
   0x1   :  { %v14_v0 = vstv %s754_s8 }
   0x2   :  { %15 = vst [vmem:[#allocation2] sm:$0x1] %v14_v0 }
   0x3   :  { %16 = vsyncpa [#allocation4], 0  ;;  %s28_s13 = sshll.u32 %s749_s3, 4  ;;  %s29_s13 = int_to_ptr.hbm [resolvable:$true] %s28_s13 }
   0x4   :  { %17 = vsyncpa [#allocation6], 0  ;;  %s620_s14 = smov [#allocation3]   ;;  %s43_s18 = sshll.u32 %s751_s5, 4  ;;  %s44_s18 = int_to_ptr.hbm [resolvable:$true] %s43_s18 }
   0x5   :  { %s30_s15 = sshll.u32 %s620_s14, 4  ;;  %s621_s19 = smov 64   ;;  %s31_s15 = int_to_ptr.vmem [resolvable:$true] %s30_s15 }
   0x6   :  { %s622_s20 = smov 4   ;;  %s623_s8 = smov [#allocation5]  }
   0x7   :  { %36 = dma.hbm_to_vmem [thread:$0]  %s29_s13, 1024, %s31_s15, [#allocation4], %s621_s19, %s621_s19, %s622_s20  }
   0x8   :  { %s45_s21 = sshll.u32 %s623_s8, 4  ;;  %s46_s21 = int_to_ptr.vmem [resolvable:$true] %s45_s21 }
   0x9   :  { %51 = dma.hbm_to_vmem [thread:$0]  %s44_s18, 1024, %s46_s21, [#allocation6], %s621_s19, %s621_s19, %s622_s20  }
   0xa   :  { %616 = dma.done.wait [#allocation4], 1024  }
   0xb   :  { %617 = vsyncadd [#allocation4], 4294966272 }
   0xc   :  { %618 = dma.done.wait [#allocation6], 1024  }
   0xd   :  { %619 = vsyncadd [#allocation6], 4294966272  ;;  %v544_v1 = vld [vmem:[#allocation3 + $0x38] sm:$0xff]  ;;  %v543_v3 = vld [vmem:[#allocation3 + $0x30] sm:$0xff]  ;;  %vm393_vm0 = vcmask 7168  }
   0xe   :  { %v536_v2 = vld [vmem:[%s748_s2 + $0x38] sm:$0xff]  ;;  %148 = vmatpush.bf16.msra.mxu0 %v544_v1  ;;  %v535_v4 = vld [vmem:[%s748_s2 + $0x30] sm:$0xff]  ;;  %v534_v6 = vld [vmem:[%s748_s2 + $0x28] sm:$0xff] }
   0xf   :  { %209 = vmatpush.bf16.msra.mxu1 %v536_v2  ;;  %v542_v5 = vld [vmem:[#allocation3 + $0x28] sm:$0xff]  ;;  %v552_v7 = vld [vmem:[#allocation5 + $0x38] sm:$0xff]  ;;  %v551_v8 = vld [vmem:[#allocation5 + $0x30] sm:$0xff] }
  0x10   :  { %297 = vmatpush.bf16.msra.mxu2 %v552_v7  ;;  %v541_v9 = vld [vmem:[#allocation3 + $0x20] sm:$0xff]  ;;  %v550_v11 = vld [vmem:[#allocation5 + $0x28] sm:$0xff]  ;;  %v540_v12 = vld [vmem:[#allocation3 + $0x18] sm:$0xff] }
  0x11   :  { %v533_v10 = vld [vmem:[%s748_s2 + $0x20] sm:$0xff]  ;;  %v532_v13 = vld [vmem:[%s748_s2 + $0x18] sm:$0xff]  ;;  %v531_v16 = vld [vmem:[%s748_s2 + $0x10] sm:$0xff] }
  0x12   :  { %149 = vmatpush.bf16.msra.mxu0 %v543_v3  ;;  %v549_v14 = vld [vmem:[#allocation5 + $0x20] sm:$0xff]  ;;  %v539_v15 = vld [vmem:[#allocation3 + $0x10] sm:$0xff]  ;;  %v548_v17 = vld [vmem:[#allocation5 + $0x18] sm:$0xff] }
  0x13   :  { %210 = vmatpush.bf16.msra.mxu1 %v535_v4  ;;  %v538_v18 = vld [vmem:[#allocation3 + $0x8] sm:$0xff]  ;;  %v547_v20 = vld [vmem:[#allocation5 + $0x10] sm:$0xff]  ;;  %v537_v21 = vld [vmem:[#allocation3] sm:$0xff] }
  0x14   :  { %298 = vmatpush.bf16.msra.mxu2 %v551_v8  ;;  %v530_v19 = vld [vmem:[%s748_s2 + $0x8] sm:$0xff]  ;;  %v529_v22 = vld [vmem:[%s748_s2] sm:$0xff]  ;;  %v560_v27 = vld [vmem:[%s753_s7 + $0x38] sm:$0xff] }
  0x15   :  { %v83_v23 = vld [vmem:[%s747_s1] sm:$0xf]  ;;  %v546_v25 = vld [vmem:[#allocation5 + $0x8] sm:$0xff]  ;;  %380 = vmatpush.bf16.msra.mxu3 %v560_v27  ;;  %v556_v31 = vld [vmem:[%s753_s7 + $0x18] sm:$0xff] }
  0x16   :  { %150 = vmatpush.bf16.msra.mxu0 %v542_v5  ;;  %v66_v24 = vld [vmem:[%s746_s0] sm:$0xf]  ;;  %v559_v28 = vld [vmem:[%s753_s7 + $0x30] sm:$0xff]  ;;  %v558_v29 = vld [vmem:[%s753_s7 + $0x28] sm:$0xff] }
  0x17   :  { %211 = vmatpush.bf16.msra.mxu1 %v534_v6  ;;  %v545_v26 = vld [vmem:[#allocation5] sm:$0xff]  ;;  %v555_v32 = vld [vmem:[%s753_s7 + $0x10] sm:$0xff]  ;;  %v565_v33 = vld [vmem:[%s750_s4] ss:$0 sm:$0xff] }
  0x18   :  { %299 = vmatpush.bf16.msra.mxu2 %v550_v11  ;;  %v557_v30 = vld [vmem:[%s753_s7 + $0x20] sm:$0xff]  ;;  %v554_v42 = vld [vmem:[%s753_s7 + $0x8] sm:$0xff] }
  0x19   :  { %381 = vmatpush.bf16.msra.mxu3 %v559_v28  ;;  %v553_v43 = vld [vmem:[%s753_s7] sm:$0xff] }
  0x1a   :  { %151 = vmatpush.bf16.msra.mxu0 %v541_v9  ;;  %v566_v44 = vld [vmem:[%s752_s6] ss:$0 sm:$0xff] }
  0x1b   :  { %212 = vmatpush.bf16.msra.mxu1 %v533_v10  ;;  %v567_v50 = vld [vmem:[#allocation2] ss:$0 sm:$0xff] }
  0x1c   :  { %300 = vmatpush.bf16.msra.mxu2 %v549_v14 }
  0x1d   :  { %382 = vmatpush.bf16.msra.mxu3 %v558_v29 }
  0x1e   :  { %152 = vmatpush.bf16.msra.mxu0 %v540_v12 }
  0x1f   :  { %213 = vmatpush.bf16.msra.mxu1 %v532_v13 }
  0x20   :  { %301 = vmatpush.bf16.msra.mxu2 %v548_v17 }
  0x21   :  { %383 = vmatpush.bf16.msra.mxu3 %v557_v30 }
  0x22   :  { %153 = vmatpush.bf16.msra.mxu0 %v539_v15 }
  0x23   :  { %214 = vmatpush.bf16.msra.mxu1 %v531_v16 }
  0x24   :  { %302 = vmatpush.bf16.msra.mxu2 %v547_v20 }
  0x25   :  { %384 = vmatpush.bf16.msra.mxu3 %v556_v31 }
  0x26   :  { %154 = vmatpush.bf16.msra.mxu0 %v538_v18 }
  0x27   :  { %215 = vmatpush.bf16.msra.mxu1 %v530_v19 }
  0x28   :  { %303 = vmatpush.bf16.msra.mxu2 %v546_v25 }
  0x29   :  { %385 = vmatpush.bf16.msra.mxu3 %v555_v32 }
  0x2a   :  { %155 = vmatpush.bf16.msra.mxu0 %v537_v21 }
  0x2b   :  { %216 = vmatpush.bf16.msra.mxu1 %v529_v22 }
  0x2c   :  { %304 = vmatpush.bf16.msra.mxu2 %v545_v26 }
  0x2d   :  { %156 = vmatmul.bf16.vlgmr.msra.gmra.mxu0 %v83_v23  ;;  %386 = vmatpush.bf16.msra.mxu3 %v554_v42 }
  0x2e   :  { %217 = vmatmul.bf16.vlgmr.msra.gmra.mxu1 %v66_v24 }
  0x31   :  { %387 = vmatpush.bf16.msra.mxu3 %v553_v43 }
  0xaa   :  { %v157_v34 = vpop.f32.mrf.mxu0 }
  0xab   :  { %v218_v35 = vpop.f32.mrf.mxu1 }
  0xac   :  { %v219_v36 = vadd.f32 %v218_v35, %v157_v34 }
  0xae   :  { %v226_v37 = vadd.f32 %v565_v33, %v219_v36 }
  0xb0   :  { %v227_v38 = vmax.f32 %v226_v37, 0.0 }
  0xb2   :  { %v228_v39 = vpack.c.bf16 %v227_v38, %v227_v38  ;;  %v159_v40 = vpop.f32.mrf.mxu0 }
  0xb3   :  { %v220_v41 = vpop.f32.mrf.mxu1 }
  0xb4   :  { %305 = vmatmul.bf16.vlgmr.msra.gmra.mxu2 %v228_v39 }
 0x137   :  { %v306_v45 = vpop.f32.mrf.mxu2 }
 0x138   :  { %v307_v46 = vadd.f32 %v566_v44, %v306_v45 }
 0x13a   :  { %v310_v47 = vmax.f32 %v307_v46, 0.0 }
 0x13c   :  { %v311_v48 = vpack.c.bf16 %v310_v47, %v310_v47 }
 0x13e   :  { %388 = vmatmul.bf16.vlgmr.msra.gmra.mxu3 %v311_v48 }
 0x13f   :  { %v308_v49 = vpop.f32.mrf.mxu2 }
 0x1c1   :  { %v389_v51 = vpop.f32.mrf.mxu3 }
 0x1c2   :  { %v390_v52 = vadd.f32 %v567_v50, %v389_v51 }
 0x1c4   :  { %394 = vst.msk [vmem:[%s755_s9] sm:$0xff] %vm393_vm0, %v390_v52 }
 0x1c9   :  { %v391_v53 = vpop.f32.mrf.mxu3 }
 0x1ca   :  { %399 = vsyncpa [#allocation4], 1 }
 0x1cb   :  { %400 = vsyncpa [#allocation6], 1 }

</bundles_post_ra>
